<compile_context>
chip_gen: v6e
topology: v6e:2x2x1
jax: 0.10.0
libtpu: 0.0.40
codegen_flags: <defaults>
</compile_context>

<pallas_src>
import functools

import jax
import jax.numpy as jnp
from jax.experimental import pallas as pl
from jax.experimental.pallas import tpu as pltpu


def _round_up(a, b):
    return (a + b - 1) // b * b


def _soft_target_ce_kernel(x_ref, y_ref, loss_ref, *, n_total, block_n):
    i = pl.program_id(0)

    x = x_ref[...].astype(jnp.float32)   # (block_n, C)
    y = y_ref[...].astype(jnp.float32)   # (block_n, C)

    # Numerically-stable log_softmax along the last (lane) axis.
    m = jnp.max(x, axis=-1, keepdims=True)                               # (bn, 1)
    lse = jnp.log(jnp.sum(jnp.exp(x - m), axis=-1, keepdims=True)) + m   # (bn, 1)
    logp = x - lse                                                       # (bn, C)

    contrib = y * logp                                                   # (bn, C)

    # Lane-dense per-row reduction on the MXU:
    #   row_sum[0, j] = sum_c contrib[j, c]
    # i.e. ones(1, C) contracted with contrib along C ("A @ B^T" form), so the
    # per-sample losses land on the lane axis and the store below is a
    # full-width, unmasked vector store.
    ones = jnp.ones((1, contrib.shape[-1]), jnp.float32)
    row_sum = jax.lax.dot_general(
        ones, contrib,
        dimension_numbers=(((1,), (1,)), ((), ())),
        preferred_element_type=jnp.float32)                              # (1, bn)
    row_loss = -row_sum

    # Mask rows past N (tail block when N % block_n != 0) — padding rows of
    # the edge input block contain garbage, but each output lane depends only
    # on its own row, so zeroing the invalid lanes is sufficient.
    col = jax.lax.broadcasted_iota(jnp.int32, (1, block_n), 1)
    valid = (i * block_n + col) < n_total
    loss_ref[...] = jnp.where(valid, row_loss, 0.0)


def _pick_block_n(n, c, bytes_per_row_pair, requested, input_budget_bytes):
    # 2 inputs x 2 pipeline buffers of (block_n, C) rows must fit the budget.
    max_rows = max(1, input_budget_bytes // max(1, 2 * bytes_per_row_pair))
    bn = min(requested, max_rows, _round_up(n, 128))
    return max(128, (bn // 128) * 128)   # keep the output lane-dense


def soft_target_cross_entropy(x, y, reduction="mean", *, block_n=1024,
                              input_vmem_budget_bytes=24 * 1024 * 1024):
    """x: (N, C) logits, y: (N, C) soft targets. Same semantics as the PyTorch module."""
    n, c = x.shape
    assert y.shape == (n, c)

    bytes_per_row_pair = c * (x.dtype.itemsize + y.dtype.itemsize)
    bn = _pick_block_n(n, c, bytes_per_row_pair, block_n, input_vmem_budget_bytes)
    num_blocks = pl.cdiv(n, bn)
    n_padded = num_blocks * bn

    # Double-buffered inputs + slack for outputs / internal scratch, capped to
    # stay inside v7x's 64 MiB physical VMEM.
    vmem_limit = int(min(2 * bn * bytes_per_row_pair + (4 << 20), 56 << 20))

    kernel = functools.partial(_soft_target_ce_kernel, n_total=n, block_n=bn)

    cost = pl.CostEstimate(
        flops=8 * n * c,
        transcendentals=n * (c + 1),
        bytes_accessed=x.size * x.dtype.itemsize + y.size * y.dtype.itemsize
        + 4 * n_padded,
    )

    loss_padded = pl.pallas_call(
        kernel,
        out_shape=jax.ShapeDtypeStruct((1, n_padded), jnp.float32),
        grid=(num_blocks,),
        in_specs=[
            pl.BlockSpec((bn, c), lambda i: (i, 0)),
            pl.BlockSpec((bn, c), lambda i: (i, 0)),
        ],
        out_specs=pl.BlockSpec((1, bn), lambda i: (0, i)),
        compiler_params=pltpu.CompilerParams(
            dimension_semantics=("parallel",),   # no cross-step state -> megacore OK
            vmem_limit_bytes=vmem_limit,
        ),
        cost_estimate=cost,
    )(x, y)

    loss = loss_padded[0, :n]
    if reduction == "mean":
        return loss.mean()   # hoisted reduction: trivial in plain JAX
    elif reduction == "none":
        return loss
    else:
        raise NotImplementedError


if __name__ == "__main__":
    key = jax.random.PRNGKey(0)
    kx, ky = jax.random.split(key)

    # Small, spec-consistent shapes: N logits over C classes.  N is chosen so
    # it is NOT a multiple of the block size (exercises the masked tail block)
    # and block_n=128 forces a multi-step grid at this small size.
    N, C = 300, 128
    x = jax.random.normal(kx, (N, C), dtype=jnp.float32)
    # soft targets (e.g. mixup / label smoothing): rows sum to 1
    y = jax.nn.softmax(jax.random.normal(ky, (N, C), dtype=jnp.float32), axis=-1)

    loss_none = jax.block_until_ready(
        soft_target_cross_entropy(x, y, reduction="none", block_n=128))
    loss_mean = jax.block_until_ready(
        soft_target_cross_entropy(x, y, reduction="mean", block_n=128))

    # pure-JAX reference (tolerance is modest because the per-row reduction
    # runs on the MXU)
    ref_rows = jnp.sum(-y * jax.nn.log_softmax(x, axis=-1), axis=-1)
    assert loss_none.shape == (N,)
    assert jnp.allclose(loss_none, ref_rows, rtol=5e-3, atol=5e-3)
    assert jnp.allclose(loss_mean, ref_rows.mean(), rtol=5e-3, atol=5e-3)

    print("KERNEL_OK")
</pallas_src>

<mosaic_0001>
module attributes {stable_mosaic.version = 11 : i64} {
  func.func @_soft_target_ce_kernel(%arg0: i32, %arg1: memref<128x128xf32, #tpu.memory_space<vmem>>, %arg2: memref<128x128xf32, #tpu.memory_space<vmem>>, %arg3: memref<1x128xf32, #tpu.memory_space<vmem>>) attributes {dimension_semantics = [#tpu.dimension_semantics<parallel>], iteration_bounds = array<i64: 3>, scalar_prefetch = 0 : i64, scratch_operands = 0 : i64, tpu.core_type = #tpu.core_type<tc>, window_params = [{transform_indices = @transform_0, window_bounds = array<i64: 128, 128>}, {transform_indices = @transform_1, window_bounds = array<i64: 128, 128>}, {transform_indices = @transform_2, window_bounds = array<i64: 1, 128>}]} {
    %c0 = arith.constant 0 : index
    %c0_0 = arith.constant 0 : index
    %0 = vector.load %arg1[%c0, %c0_0] : memref<128x128xf32, #tpu.memory_space<vmem>>, vector<128x128xf32>
    %c0_1 = arith.constant 0 : index
    %c0_2 = arith.constant 0 : index
    %1 = vector.load %arg2[%c0_1, %c0_2] : memref<128x128xf32, #tpu.memory_space<vmem>>, vector<128x128xf32>
    %cst = arith.constant dense<0xFF800000> : vector<128xf32>
    %2 = vector.multi_reduction <maximumf>, %0, %cst [1] : vector<128x128xf32> to vector<128xf32>
    %3 = vector.shape_cast %2 : vector<128xf32> to vector<128x1xf32>
    %4 = vector.broadcast %3 : vector<128x1xf32> to vector<128x128xf32>
    %5 = arith.subf %0, %4 : vector<128x128xf32>
    %6 = math.exp %5 : vector<128x128xf32>
    %cst_3 = arith.constant dense<0.000000e+00> : vector<128xf32>
    %7 = vector.multi_reduction <add>, %6, %cst_3 [1] : vector<128x128xf32> to vector<128xf32>
    %8 = vector.shape_cast %7 : vector<128xf32> to vector<128x1xf32>
    %9 = math.log %8 : vector<128x1xf32>
    %10 = arith.addf %9, %3 : vector<128x1xf32>
    %11 = vector.broadcast %10 : vector<128x1xf32> to vector<128x128xf32>
    %12 = arith.subf %0, %11 : vector<128x128xf32>
    %13 = arith.mulf %1, %12 : vector<128x128xf32>
    %cst_4 = arith.constant 1.000000e+00 : f32
    %14 = vector.broadcast %cst_4 : f32 to vector<1x128xf32>
    %cst_5 = arith.constant dense<0.000000e+00> : vector<1x128xf32>
    %15 = tpu.matmul %14, %13, %cst_5 {dimension_numbers = #tpu.dot_dimension_numbers<[1], [1], [0], [0], [0, 0, 1, 0], [], []>} : vector<1x128xf32>, vector<128x128xf32>, vector<1x128xf32> -> vector<1x128xf32>
    %cst_6 = arith.constant 0.000000e+00 : f32
    %16 = vector.broadcast %cst_6 : f32 to vector<1x128xf32>
    %17 = arith.subf %16, %15 : vector<1x128xf32>
    %18 = tpu.iota {dimensions = array<i32: 1>} : vector<1x128xi32>
    %c128_i32 = arith.constant 128 : i32
    %19 = arith.muli %arg0, %c128_i32 : i32
    %20 = vector.broadcast %19 : i32 to vector<1x128xi32>
    %21 = arith.addi %20, %18 : vector<1x128xi32>
    %c300_i32 = arith.constant 300 : i32
    %22 = vector.broadcast %c300_i32 : i32 to vector<1x128xi32>
    %23 = arith.cmpi slt, %21, %22 : vector<1x128xi32>
    %cst_7 = arith.constant 0.000000e+00 : f32
    %24 = vector.broadcast %cst_7 : f32 to vector<1x128xf32>
    %25 = arith.select %23, %17, %24 : vector<1x128xi1>, vector<1x128xf32>
    %c0_8 = arith.constant 0 : index
    %c0_9 = arith.constant 0 : index
    %26 = vector.load %arg3[%c0_8, %c0_9] : memref<1x128xf32, #tpu.memory_space<vmem>>, vector<1x128xf32>
    tpu.vector_store %arg3[%c0_8, %c0_9], %25 {strides = array<i32>} : memref<1x128xf32, #tpu.memory_space<vmem>>, vector<1x128xf32>,
    return
  }
  func.func @transform_0(%arg0: i32) -> (i32, i32) {
    %c0_i32 = arith.constant 0 : i32
    %c0_i32_0 = arith.constant 0 : i32
    return %arg0, %c0_i32 : i32, i32
  }
  func.func @transform_1(%arg0: i32) -> (i32, i32) {
    %c0_i32 = arith.constant 0 : i32
    %c0_i32_0 = arith.constant 0 : i32
    return %arg0, %c0_i32 : i32, i32
  }
  func.func @transform_2(%arg0: i32) -> (i32, i32) {
    %c0_i32 = arith.constant 0 : i32
    %c0_i32_0 = arith.constant 0 : i32
    return %c0_i32, %arg0 : i32, i32
  }
}

</mosaic_0001>

<bundles_post_ra>
// kernel: tpu_custom_call.1
= control target key start
LH: loop header
LB: loop body
LE: loop exit
PB: predicated region body
PF: predicated region fallthrough
CT: control target
= control target key end

     0   :  { %7 = vsyncpa [#allocation3], 0  ;;  %s1363_s0 = inlined_call_operand.hbm [shape: f32[300,128], index: 0, kind: input, shape index: {}]   ;;  %s1364_s1 = inlined_call_operand.hbm [shape: f32[300,128], index: 1, kind: input, shape index: {}]   ;;  %s1365_s2 = inlined_call_operand.hbm [shape: f32[1,384], index: 2, kind: output, shape index: {}]  }
   0x1   :  { %9 = vsyncpa [#allocation3 + $0x1], 0 }
   0x2   :  { %10 = vsyncpa [#allocation6], 0 }
   0x3   :  { %12 = vsyncpa [#allocation6 + $0x1], 0 }
   0x4   :  { %13 = vsyncpa [#allocation4], 0 }
   0x5   :  { %15 = vsyncpa [#allocation4 + $0x1], 0  ;;  %s965_s9 = smov 0   ;;  %s967_s10 = smov 0  }
   0x6   :  { %s969_s11 = smov 0   ;;  %s971_s12 = smov 0  }
   0x7 LB: > { %s986_s13 = sadd.s32 4294967295, %s938_s12   ;;  %s628_s14 = sadd.s32 4294967294, %s938_s12   ;;  %s938_s12 = sphi %s971_s12, %s1376_s12   ;;  %s934_s11 = sphi %s969_s11, %s1375_s11   ;;  %s930_s10 = sphi %s967_s10, %s1374_s10   ;;  %s926_s9 = sphi %s965_s9, %s1373_s9  }
   0x8   : > { %s990_s15 = sadd.s32 1, %s938_s12   ;;  %s28_s16 = sadd.s32 1, %s934_s11 }
   0x9   : > { %s25_s17 = ssub.s32 %s938_s12, %s990_s15  ;;  %p35_p0 = scmp.ne.s32.totalorder %s934_s11, %s930_s10 }
   0xa   : > { %p26_p1 = scmp.eq.s32.totalorder %s25_s17, 0  ;;  %p36_p2 = scmp.eq.s32.totalorder %s938_s12, 0 }
   0xb   : > { %p41_p3 = scmp.ne.s32.totalorder %s930_s10, %s926_s9  ;;  %p42_p4 = scmp.eq.s32.totalorder %s986_s13, 0 }
   0xc   : > { %s1002_s18 = scalar_select %p26_p1, %s934_s11, %s28_s16  }
   0xd   : > { %p1004_p5 = por %p36_p2, %p35_p0  ;;  %p1008_p6 = por %p42_p4, %p41_p3 }
   0xe   : > { %p91_p7 = scmp.eq.s32.totalorder %s986_s13, 2  ;;  %p97_p8 = scmp.eq.s32.totalorder %s628_s14, 2 }
   0xf   : > { %p630_p11 = scmp.ge.s32.totalorder %s938_s12, 3 }
  0x10   : > { %p1013_p9 = por %p91_p7, %p35_p0  ;;  %p1017_p10 = por %p97_p8, %p41_p3 }
  0x11   : > { %113 = sbr.rel (%p630_p11) target bundleno = 86 (0x56), region = 16 }
  0x12   : > { %s1369_s21 = scalar_select %p1013_p9, 1, 0 }
  0x13   : > { %s1370_s22 = scalar_select %p1017_p10, 1, 0 }
  0x16   : > { %116 = sbr.rel (!%p1004_p5) target bundleno = 54 (0x36), region = 20  ;;  %s117_s23 = sand.u32 (%p1004_p5), 1, %s934_s11  }
  0x17   : > { %s632_s24 = sshll.u32 (%p1004_p5), %s938_s12, 4  ;;  %s631_s25 = sshll.u32 (%p1004_p5), %s117_s23, 7 }
  0x18   : > { %s123_s26 = ssub.s32 (%p1004_p5), 38, %s632_s24  ;;  %s1029_s29 = scalar_lea.sflag (%p1004_p5), [#allocation3], %s117_s23 }
  0x19   : > { %p124_p12 = scmp.lt.s32.totalorder (%p1004_p5), %s123_s26, 16  ;;  %s121_s30 = scalar_lea.vmem (%p1004_p5), [#allocation2], %s631_s25 }
  0x1b   : > { %s1378_s26 = smov (!%p124_p12, %s123_s26), 16 }
  0x1c   : > { %s1026_s27 = sshll.u32 %s1378_s26, 7 }
  0x1d   : > { %s128_s28 = ssub.s32 2048, %s1026_s27 }
  0x1e   : > { %129 = vsyncadd %s1029_s29, %s128_s28  ;;  %p634_p13 = scmp.ne.s32.totalorder %s1026_s27, 0  ;;  %s652_s3 = sshll.u32 %s938_s12, 11 }
  0x1f   : > { %s1037_s6 = scalar_lea.hbm %s1363_s0, %s652_s3  ;;  %s134_s7 = sshll.u32 %s121_s30, 4  ;;  %s1039_s7 = int_to_ptr.vmem [resolvable:$true] %s134_s7 }
  0x20   : > { %s818_s8 = scalar_lea.hbm %s1037_s6, %s1026_s27  ;;  %s822_s17 = scalar_lea.hbm %s1363_s0, 4864 }
  0x21   : > { %p819_p0 = scmp.ne.s32.totalorder %s1037_s6, %s818_s8  ;;  %p823_p3 = scmp.lt.s32.totalorder %s1037_s6, %s1363_s0 }
  0x22   : > { %p824_p4 = scmp.lt.s32.totalorder %s822_s17, %s818_s8 }
  0x23   : > { %p820_p1 = pnand %p819_p0, %p634_p13 }
  0x24   : > { %p825_p7 = por %p824_p4, %p823_p3 }
  0x25   : > { %p821_p2 = pneg %p820_p1 }
  0x27   : > { %p826_p8 = pnand %p825_p7, %p821_p2 }
  0x29   : > { %829 = shalt.err (!%p826_p8)
}
  0x2a   : > { %s830_s25 = scalar_lea.vmem %s1039_s7, %s1026_s27  ;;  %s940_s26 = smov [#allocation2]  }
  0x2b   : > { %p831_p11 = scmp.ne.s32.totalorder %s1039_s7, %s830_s25  ;;  %s834_s28 = sshll.u32 %s940_s26, 4  ;;  %s835_s28 = int_to_ptr.vmem [resolvable:$false] %s834_s28 }
  0x2c   : > { %s836_s30 = scalar_lea.vmem %s835_s28, 4096  ;;  %p837_p1 = scmp.lt.s32.totalorder %s1039_s7, %s835_s28 }
  0x2d   : > { %p832_p12 = pnand %p831_p11, %p634_p13  ;;  %p838_p10 = scmp.lt.s32.totalorder %s836_s30, %s830_s25 }
  0x2f   : > { %p833_p0 = pneg %p832_p12  ;;  %p839_p9 = por %p838_p10, %p837_p1 }
  0x31   : > { %p840_p3 = pnand %p839_p9, %p833_p0 }
  0x33   : > { %843 = shalt.err (!%p840_p3)
}
  0x34   : > { %s941_s3 = smov 128   ;;  %s942_s4 = smov 8  }
  0x35   : > { %140 = dma.hbm_to_vmem [thread:$0]  (%p634_p13), %s1037_s6, %s1026_s27, %s1039_s7, %s1029_s29, %s941_s3, %s941_s3, %s942_s4  }
  0x36 PF: > { %143 = sbr.rel (!%p1004_p5) target bundleno = 86 (0x56), region = 24  ;;  %s144_s5 = sand.u32 (%p1004_p5), 1, %s934_s11  }
  0x37   : > { %s639_s8 = sshll.u32 (%p1004_p5), %s938_s12, 4  ;;  %s638_s14 = sshll.u32 (%p1004_p5), %s144_s5, 7 }
  0x38   : > { %s150_s16 = ssub.s32 (%p1004_p5), 38, %s639_s8  ;;  %s1072_s24 = scalar_lea.sflag (%p1004_p5), [#allocation6], %s144_s5 }
  0x39   : > { %p151_p9 = scmp.lt.s32.totalorder (%p1004_p5), %s150_s16, 16  ;;  %s148_s27 = scalar_lea.vmem (%p1004_p5), [#allocation5], %s638_s14 }
  0x3b   : > { %s1380_s16 = smov (!%p151_p9, %s150_s16), 16 }
  0x3c   : > { %s1069_s17 = sshll.u32 %s1380_s16, 7 }
  0x3d   : > { %s155_s23 = ssub.s32 2048, %s1069_s17 }
  0x3e   : > { %156 = vsyncadd %s1072_s24, %s155_s23  ;;  %p641_p5 = scmp.ne.s32.totalorder %s1069_s17, 0  ;;  %s653_s19 = sshll.u32 %s938_s12, 11 }
  0x3f   : > { %s1080_s7 = scalar_lea.hbm %s1364_s1, %s653_s19  ;;  %s161_s25 = sshll.u32 %s148_s27, 4  ;;  %s1082_s25 = int_to_ptr.vmem [resolvable:$true] %s161_s25 }
  0x40   : > { %s844_s26 = scalar_lea.hbm %s1080_s7, %s1069_s17  ;;  %s848_s3 = scalar_lea.hbm %s1364_s1, 4864 }
  0x41   : > { %p845_p10 = scmp.ne.s32.totalorder %s1080_s7, %s844_s26  ;;  %p849_p4 = scmp.lt.s32.totalorder %s1080_s7, %s1364_s1 }
  0x42   : > { %p850_p7 = scmp.lt.s32.totalorder %s848_s3, %s844_s26 }
  0x43   : > { %p846_p13 = pnand %p845_p10, %p641_p5 }
  0x44   : > { %p851_p8 = por %p850_p7, %p849_p4 }
  0x45   : > { %p847_p2 = pneg %p846_p13 }
  0x47   : > { %p852_p11 = pnand %p851_p8, %p847_p2 }
  0x49   : > { %855 = shalt.err (!%p852_p11)
}
  0x4a   : > { %s856_s8 = scalar_lea.vmem %s1082_s25, %s1069_s17  ;;  %s943_s14 = smov [#allocation5]  }
  0x4b   : > { %p857_p12 = scmp.ne.s32.totalorder %s1082_s25, %s856_s8  ;;  %s860_s16 = sshll.u32 %s943_s14, 4  ;;  %s861_s16 = int_to_ptr.vmem [resolvable:$false] %s860_s16 }
  0x4c   : > { %s862_s23 = scalar_lea.vmem %s861_s16, 4096  ;;  %p863_p3 = scmp.lt.s32.totalorder %s1082_s25, %s861_s16 }
  0x4d   : > { %p858_p0 = pnand %p857_p12, %p641_p5  ;;  %p864_p9 = scmp.lt.s32.totalorder %s862_s23, %s856_s8 }
  0x4f   : > { %p859_p1 = pneg %p858_p0  ;;  %p865_p10 = por %p864_p9, %p863_p3 }
  0x51   : > { %p866_p13 = pnand %p865_p10, %p859_p1 }
  0x53   : > { %869 = shalt.err (!%p866_p13)
}
  0x54   : > { %s944_s27 = smov 128   ;;  %s945_s19 = smov 8  }
  0x55   : > { %167 = dma.hbm_to_vmem [thread:$0]  (%p641_p5), %s1080_s7, %s1069_s17, %s1082_s25, %s1072_s24, %s944_s27, %s944_s27, %s945_s19  }
  0x56 PF: > { %p645_p2 = scmp.ge.s32.totalorder %s938_s12, 1  ;;  %p169_p4 = scmp.lt.s32.totalorder %s938_s12, 4 }
  0x58   : > { %p170_p7 = pnand %p645_p2, %p169_p4 }
  0x59   : > { %s1111_s29 = sand.u32 (!%p170_p7), 1, %s930_s10  }
  0x5a   : > { %173 = sbr.rel (%p170_p7) target bundleno = 688 (0x2b0), region = 28  ;;  %s646_s6 = sshll.u32 (!%p170_p7), %s1111_s29, 7 }
  0x5b   : > { %s176_s26 = scalar_lea.sflag (!%p170_p7), [#allocation3], %s1111_s29  ;;  %s1115_s28 = scalar_lea.vmem (!%p170_p7), [#allocation2], %s646_s6 }
  0x5f   : > { %913 = dma.done.wait (%p1008_p6), %s176_s26, 2048  }
  0x60   : > { %915 = vsyncadd (%p1008_p6), %s176_s26, 4294965248  ;;  %s185_s17 = scalar_lea.sflag [#allocation6], %s1111_s29  ;;  %s1122_s24 = scalar_lea.vmem [#allocation5], %s646_s6 }
  0x61   : > { %917 = dma.done.wait (%p1008_p6), %s185_s17, 2048  }
  0x62   : > { %919 = vsyncadd (%p1008_p6), %s185_s17, 4294965248  ;;  %v1129_v0 = vld [vmem:[%s1115_s28 + $0x78] sm:$0xff]  ;;  %v1132_v1 = vld [vmem:[%s1115_s28 + $0x68] sm:$0xff]  ;;  %vm947_vm0 = vmmov 0   ;;  %s648_s20 = sshll.u32 %s986_s13, 7  ;;  %s649_s7 = sshll.u32 %s986_s13, 4 }
  0x63   : > { %285 = vmax.xlane.f32.xlu0 %v1129_v0  ;;  %281 = vmax.xlane.f32.xlu1 %v1132_v1  ;;  %v1137_v2 = vld [vmem:[%s1115_s28 + $0x70] sm:$0xff]  ;;  %v1140_v3 = vld [vmem:[%s1115_s28 + $0x60] sm:$0xff]  ;;  %v1145_v4 = vld [vmem:[%s1115_s28 + $0x58] sm:$0xff]  ;;  %s212_s25 = scalar_lea.vmem [#allocation7], %s1111_s29  ;;  %s1327_s5 = scalar_lea.hbm %s1365_s2, %s649_s7 }
  0x64   : > { %v1148_v5 = vld [vmem:[%s1115_s28 + $0x50] sm:$0xff]  ;;  %v1153_v6 = vld [vmem:[%s1115_s28 + $0x48] sm:$0xff]  ;;  %v1156_v7 = vld [vmem:[%s1115_s28 + $0x40] sm:$0xff]  ;;  %s539_s30 = sshll.u32 %s212_s25, 4  ;;  %s527_s8 = scalar_lea.sflag [#allocation4], %s1111_s29  ;;  %s540_s30 = int_to_ptr.vmem [resolvable:$true] %s539_s30 }
  0x65   : > { %v1161_v8 = vld [vmem:[%s1115_s28 + $0x38] sm:$0xff]  ;;  %v1164_v9 = vld [vmem:[%s1115_s28 + $0x30] sm:$0xff]  ;;  %v1169_v10 = vld [vmem:[%s1115_s28 + $0x28] sm:$0xff]  ;;  %s870_s14 = scalar_lea.vmem %s540_s30, 16  ;;  %p1371_p5 = scmp.ne.s32.totalorder %s1369_s21, 0 }
  0x66   : > { %v1172_v11 = vld [vmem:[%s1115_s28 + $0x20] sm:$0xff]  ;;  %v1177_v12 = vld [vmem:[%s1115_s28 + $0x18] sm:$0xff]  ;;  %v1180_v13 = vld [vmem:[%s1115_s28 + $0x10] sm:$0xff]  ;;  %p871_p6 = scmp.ne.s32.totalorder %s540_s30, %s870_s14  ;;  %s949_s13 = smov [#allocation7]  }
  0x67   : > { %283 = vmax.xlane.f32.xlu0 %v1137_v2  ;;  %279 = vmax.xlane.f32.xlu1 %v1140_v3  ;;  %v1185_v14 = vld [vmem:[%s1115_s28 + $0x8] sm:$0xff]  ;;  %v1188_v15 = vld [vmem:[%s1115_s28] sm:$0xff]  ;;  %s874_s16 = sshll.u32 %s949_s13, 4  ;;  %s875_s16 = int_to_ptr.vmem [resolvable:$false] %s874_s16 }
  0x68   : > { %p872_p8 = pnand %p871_p6, %p1371_p5  ;;  %s876_s23 = scalar_lea.vmem %s875_s16, 32 }
  0x69   : > { %p877_p12 = scmp.lt.s32.totalorder %s540_s30, %s875_s16  ;;  %p878_p0 = scmp.lt.s32.totalorder %s876_s23, %s870_s14 }
  0x6a   : > { %p873_p11 = pneg %p872_p8 }
  0x6b   : > { %277 = vmax.xlane.f32.xlu0 %v1145_v4  ;;  %275 = vmax.xlane.f32.xlu1 %v1148_v5  ;;  %p879_p1 = por %p878_p0, %p877_p12 }
  0x6d   : > { %p880_p3 = pnand %p879_p1, %p873_p11 }
  0x6f   : > { %273 = vmax.xlane.f32.xlu0 %v1153_v6  ;;  %271 = vmax.xlane.f32.xlu1 %v1156_v7 }
  0x73   : > { %269 = vmax.xlane.f32.xlu0 %v1161_v8  ;;  %267 = vmax.xlane.f32.xlu1 %v1164_v9 }
  0x77   : > { %265 = vmax.xlane.f32.xlu0 %v1169_v10  ;;  %263 = vmax.xlane.f32.xlu1 %v1172_v11 }
  0x7b   : > { %261 = vmax.xlane.f32.xlu0 %v1177_v12  ;;  %259 = vmax.xlane.f32.xlu1 %v1180_v13 }
  0x7f   : > { %257 = vmax.xlane.f32.xlu0 %v1185_v14  ;;  %255 = vmax.xlane.f32.xlu1 %v1188_v15 }
  0xec   : > { %v1192_v16 = vpop.xlane.xlu0 %285  ;;  %v1194_v17 = vpop.xlane.xlu1 %281 }
  0xed   : > { %v302_v18 = vsub.f32 %v1129_v0, %v1192_v16  ;;  %v300_v19 = vsub.f32 %v1132_v1, %v1194_v17 }
  0xef   : > { %v333_v20 = vmul.f32 1.442695, %v302_v18  ;;  %v329_v21 = vmul.f32 1.442695, %v300_v19 }
  0xf0   : > { %v1200_v22 = vpop.xlane.xlu0 %283  ;;  %v1202_v23 = vpop.xlane.xlu1 %279 }
  0xf1   : > { %754 = vpow2.f32 %v333_v20  ;;  %v301_v24 = vsub.f32 %v1137_v2, %v1200_v22  ;;  %v299_v25 = vsub.f32 %v1140_v3, %v1202_v23 }
  0xf2   : > { %756 = vpow2.f32 %v329_v21 }
  0xf3   : > { %v331_v26 = vmul.f32 1.442695, %v301_v24  ;;  %v327_v27 = vmul.f32 1.442695, %v299_v25 }
  0xf4   : > { %v1208_v28 = vpop.xlane.xlu0 %277  ;;  %v1210_v29 = vpop.xlane.xlu1 %275 }
  0xf5   : > { %758 = vpow2.f32 %v331_v26  ;;  %v298_v30 = vsub.f32 %v1145_v4, %v1208_v28  ;;  %v297_v31 = vsub.f32 %v1148_v5, %v1210_v29 }
  0xf6   : > { %760 = vpow2.f32 %v327_v27 }
  0xf7   : > { %v325_v32 = vmul.f32 1.442695, %v298_v30  ;;  %v323_v33 = vmul.f32 1.442695, %v297_v31 }
  0xf8   : > { %v1216_v34 = vpop.xlane.xlu0 %273  ;;  %v1218_v35 = vpop.xlane.xlu1 %271 }
  0xf9   : > { %762 = vpow2.f32 %v325_v32  ;;  %v296_v36 = vsub.f32 %v1153_v6, %v1216_v34  ;;  %v295_v37 = vsub.f32 %v1156_v7, %v1218_v35 }
  0xfa   : > { %764 = vpow2.f32 %v323_v33 }
  0xfb   : > { %v321_v38 = vmul.f32 1.442695, %v296_v36  ;;  %v319_v39 = vmul.f32 1.442695, %v295_v37 }
  0xfc   : > { %v1224_v40 = vpop.xlane.xlu0 %269  ;;  %v1226_v41 = vpop.xlane.xlu1 %267 }
  0xfd   : > { %766 = vpow2.f32 %v321_v38  ;;  %v294_v42 = vsub.f32 %v1161_v8, %v1224_v40  ;;  %v293_v43 = vsub.f32 %v1164_v9, %v1226_v41 }
  0xfe   : > { %v755_v44 = vpop.eup %754  ;;  %768 = vpow2.f32 %v319_v39 }
  0xff   : > { %v317_v45 = vmul.f32 1.442695, %v294_v42  ;;  %365 = vadd.xlane.f32.xlu0 %v755_v44  ;;  %v315_v46 = vmul.f32 1.442695, %v293_v43  ;;  %v757_v47 = vpop.eup %756  ;;  %v946_v42 = vmov 0.0  }
 0x100   : > { %v1232_v48 = vpop.xlane.xlu0 %265  ;;  %v1234_v49 = vpop.xlane.xlu1 %263  ;;  %671 = vmatprep.subr.mxu0 %v946_v42  ;;  %703 = vmatprep.mubr.msk.f32.mxu0 %vm947_vm0, %v946_v42 }
 0x101   : > { %770 = vpow2.f32 %v317_v45  ;;  %v292_v50 = vsub.f32 %v1169_v10, %v1232_v48  ;;  %v291_v51 = vsub.f32 %v1172_v11, %v1234_v49 }
 0x102   : > { %v759_v52 = vpop.eup %758  ;;  %772 = vpow2.f32 %v315_v46 }
 0x103   : > { %v313_v53 = vmul.f32 1.442695, %v292_v50  ;;  %361 = vadd.xlane.f32.xlu0 %v757_v47  ;;  %363 = vadd.xlane.f32.xlu1 %v759_v52  ;;  %v311_v54 = vmul.f32 1.442695, %v291_v51  ;;  %v761_v55 = vpop.eup %760 }
 0x104   : > { %v1240_v56 = vpop.xlane.xlu0 %261  ;;  %v1242_v57 = vpop.xlane.xlu1 %259 }
 0x105   : > { %774 = vpow2.f32 %v313_v53  ;;  %v290_v58 = vsub.f32 %v1177_v12, %v1240_v56  ;;  %v289_v59 = vsub.f32 %v1180_v13, %v1242_v57 }
 0x106   : > { %v763_v60 = vpop.eup %762  ;;  %776 = vpow2.f32 %v311_v54 }
 0x107   : > { %v309_v61 = vmul.f32 1.442695, %v290_v58  ;;  %357 = vadd.xlane.f32.xlu0 %v763_v60  ;;  %359 = vadd.xlane.f32.xlu1 %v761_v55  ;;  %v307_v62 = vmul.f32 1.442695, %v289_v59  ;;  %v765_v63 = vpop.eup %764  ;;  %v254_v58 = vld [vmem:[%s1122_s24 + $0x78] sm:$0xff] }
 0x108   : > { %v1248_v18 = vpop.xlane.xlu0 %257  ;;  %v1250_v19 = vpop.xlane.xlu1 %255 }
 0x109   : > { %778 = vpow2.f32 %v309_v61  ;;  %v288_v20 = vsub.f32 %v1185_v14, %v1248_v18  ;;  %v287_v21 = vsub.f32 %v1188_v15, %v1250_v19 }
 0x10a   : > { %v767_v24 = vpop.eup %766  ;;  %780 = vpow2.f32 %v307_v62 }
 0x10b   : > { %v305_v25 = vmul.f32 1.442695, %v288_v20  ;;  %353 = vadd.xlane.f32.xlu0 %v767_v24  ;;  %355 = vadd.xlane.f32.xlu1 %v765_v63  ;;  %v303_v26 = vmul.f32 1.442695, %v287_v21  ;;  %v769_v27 = vpop.eup %768 }
 0x10d   : > { %782 = vpow2.f32 %v305_v25 }
 0x10e   : > { %v771_v30 = vpop.eup %770  ;;  %784 = vpow2.f32 %v303_v26 }
 0x10f   : > { %349 = vadd.xlane.f32.xlu0 %v771_v30  ;;  %351 = vadd.xlane.f32.xlu1 %v769_v27  ;;  %v773_v31 = vpop.eup %772  ;;  %v253_v27 = vld [vmem:[%s1122_s24 + $0x70] sm:$0xff] }
 0x112   : > { %v775_v32 = vpop.eup %774 }
 0x113   : > { %345 = vadd.xlane.f32.xlu0 %v775_v32  ;;  %347 = vadd.xlane.f32.xlu1 %v773_v31  ;;  %v777_v33 = vpop.eup %776 }
 0x116   : > { %v779_v36 = vpop.eup %778 }
 0x117   : > { %341 = vadd.xlane.f32.xlu0 %v779_v36  ;;  %343 = vadd.xlane.f32.xlu1 %v777_v33  ;;  %v781_v37 = vpop.eup %780 }
 0x11a   : > { %v783_v38 = vpop.eup %782 }
 0x11b   : > { %337 = vadd.xlane.f32.xlu0 %v783_v38  ;;  %339 = vadd.xlane.f32.xlu1 %v781_v37  ;;  %v785_v39 = vpop.eup %784  ;;  %v252_v37 = vld [vmem:[%s1122_s24 + $0x68] sm:$0xff] }
 0x11f   : > { %335 = vadd.xlane.f32.xlu1 %v785_v39 }
 0x188   : > { %v366_v43 = vpop.xlane.xlu0 %365 }
 0x189   : > { %786 = vlog2.f32 %v366_v43 }
 0x18c   : > { %v362_v44 = vpop.xlane.xlu0 %361  ;;  %v364_v45 = vpop.xlane.xlu1 %363 }
 0x18d   : > { %788 = vlog2.f32 %v362_v44 }
 0x18e   : > { %790 = vlog2.f32 %v364_v45 }
 0x190   : > { %v358_v46 = vpop.xlane.xlu0 %357  ;;  %v360_v47 = vpop.xlane.xlu1 %359 }
 0x191   : > { %792 = vlog2.f32 %v358_v46 }
 0x192   : > { %794 = vlog2.f32 %v360_v47 }
 0x194   : > { %v356_v50 = vpop.xlane.xlu1 %355  ;;  %v354_v53 = vpop.xlane.xlu0 %353 }
 0x195   : > { %796 = vlog2.f32 %v356_v50 }
 0x196   : > { %v787_v51 = vpop.eup %786  ;;  %798 = vlog2.f32 %v354_v53 }
 0x197   : > { %v398_v52 = vmul.f32 0.6931472, %v787_v51 }
 0x198   : > { %v352_v61 = vpop.xlane.xlu1 %351  ;;  %v350_v26 = vpop.xlane.xlu0 %349 }
 0x199   : > { %v414_v54 = vadd.f32 %v398_v52, %v1192_v16  ;;  %800 = vlog2.f32 %v352_v61  ;;  %v250_v52 = vld [vmem:[%s1122_s24 + $0x58] sm:$0xff] }
 0x19a   : > { %v789_v55 = vpop.eup %788  ;;  %802 = vlog2.f32 %v350_v26 }
 0x19b   : > { %v791_v59 = vpop.eup %790  ;;  %v394_v60 = vmul.f32 0.6931472, %v789_v55  ;;  %v430_v62 = vsub.f32 %v1129_v0, %v414_v54 }
 0x19c   : > { %v396_v63 = vmul.f32 0.6931472, %v791_v59  ;;  %v348_v33 = vpop.xlane.xlu1 %347 }
 0x19d   : > { %v446_v20 = vmul.f32 %v430_v62, %v254_v58  ;;  %v412_v24 = vadd.f32 %v394_v60, %v1194_v17  ;;  %804 = vlog2.f32 %v348_v33 }
 0x19e   : > { %v793_v21 = vpop.eup %792  ;;  %v413_v25 = vadd.f32 %v396_v63, %v1200_v22 }
 0x19f   : > { %v795_v16 = vpop.eup %794  ;;  %672 = vmatpush3.xpose.msra.mxu0 %v446_v20  ;;  %v390_v0 = vmul.f32 0.6931472, %v793_v21  ;;  %v428_v22 = vsub.f32 %v1132_v1, %v412_v24 }
 0x1a0   : > { %v392_v30 = vmul.f32 0.6931472, %v795_v16  ;;  %673 = vmatprep.subr.mxu0 %v946_v42  ;;  %v429_v31 = vsub.f32 %v1137_v2, %v413_v25  ;;  %v346_v2 = vpop.xlane.xlu0 %345  ;;  %v344_v47 = vpop.xlane.xlu1 %343 }
 0x1a1   : > { %v410_v38 = vadd.f32 %v390_v0, %v1208_v28  ;;  %v444_v43 = vmul.f32 %v428_v22, %v252_v37  ;;  %806 = vlog2.f32 %v346_v2  ;;  %v245_v37 = vld [vmem:[%s1122_s24 + $0x30] sm:$0xff] }
 0x1a2   : > { %v411_v32 = vadd.f32 %v392_v30, %v1202_v23  ;;  %v445_v17 = vmul.f32 %v429_v31, %v253_v27  ;;  %v797_v36 = vpop.eup %796  ;;  %v251_v23 = vld [vmem:[%s1122_s24 + $0x60] sm:$0xff]  ;;  %808 = vlog2.f32 %v344_v47 }
 0x1a3   : > { %v388_v39 = vmul.f32 0.6931472, %v797_v36  ;;  %v799_v45 = vpop.eup %798  ;;  %v426_v28 = vsub.f32 %v1145_v4, %v410_v38  ;;  %v247_v27 = vld [vmem:[%s1122_s24 + $0x40] sm:$0xff] }
 0x1a4   : > { %674 = vmatpush3.xpose.msra.mxu0 %v445_v17  ;;  %v427_v44 = vsub.f32 %v1140_v3, %v411_v32  ;;  %v386_v1 = vmul.f32 0.6931472, %v799_v45  ;;  %v342_v55 = vpop.xlane.xlu0 %341  ;;  %v340_v62 = vpop.xlane.xlu1 %339 }
 0x1a5   : > { %675 = vmatprep.subr.mxu0 %v946_v42  ;;  %v409_v46 = vadd.f32 %v388_v39, %v1210_v29  ;;  %v442_v58 = vmul.f32 %v426_v28, %v250_v52  ;;  %v249_v29 = vld [vmem:[%s1122_s24 + $0x50] sm:$0xff]  ;;  %810 = vlog2.f32 %v342_v55  ;;  %v242_v28 = vld [vmem:[%s1122_s24 + $0x18] sm:$0xff] }
 0x1a6   : > { %v443_v50 = vmul.f32 %v427_v44, %v251_v23  ;;  %v801_v51 = vpop.eup %800  ;;  %v408_v53 = vadd.f32 %v386_v1, %v1216_v34  ;;  %v248_v34 = vld [vmem:[%s1122_s24 + $0x48] sm:$0xff]  ;;  %812 = vlog2.f32 %v340_v62  ;;  %v243_v1 = vld [vmem:[%s1122_s24 + $0x20] sm:$0xff] }
 0x1a7   : > { %v803_v3 = vpop.eup %802  ;;  %v384_v54 = vmul.f32 0.6931472, %v801_v51  ;;  %v425_v59 = vsub.f32 %v1148_v5, %v409_v46 }
 0x1a8   : > { %676 = vmatpush3.xpose.msra.mxu0 %v444_v43  ;;  %v382_v60 = vmul.f32 0.6931472, %v803_v3  ;;  %v424_v20 = vsub.f32 %v1153_v6, %v408_v53  ;;  %v338_v25 = vpop.xlane.xlu0 %337  ;;  %v336_v31 = vpop.xlane.xlu1 %335  ;;  %v244_v43 = vld [vmem:[%s1122_s24 + $0x28] sm:$0xff]  ;;  %v241_v3 = vld [vmem:[%s1122_s24 + $0x10] sm:$0xff] }
 0x1a9   : > { %677 = vmatprep.subr.mxu0 %v946_v42  ;;  %v407_v61 = vadd.f32 %v384_v54, %v1218_v35  ;;  %v441_v63 = vmul.f32 %v425_v59, %v249_v29  ;;  %814 = vlog2.f32 %v338_v25  ;;  %v240_v54 = vld [vmem:[%s1122_s24 + $0x8] sm:$0xff]  ;;  %v518_v59 = vlaneseq }
 0x1aa   : > { %v805_v4 = vpop.eup %804  ;;  %v406_v21 = vadd.f32 %v382_v60, %v1224_v40  ;;  %v440_v26 = vmul.f32 %v424_v20, %v248_v34  ;;  %v246_v40 = vld [vmem:[%s1122_s24 + $0x38] sm:$0xff]  ;;  %816 = vlog2.f32 %v336_v31  ;;  %v521_v29 = vstv %s648_s20 }
 0x1ab   : > { %v380_v24 = vmul.f32 0.6931472, %v805_v4  ;;  %v423_v16 = vsub.f32 %v1156_v7, %v407_v61 }
 0x1ac   : > { %678 = vmatpush3.xpose.msra.mxu0 %v443_v50  ;;  %v422_v32 = vsub.f32 %v1161_v8, %v406_v21 }
 0x1ad   : > { %679 = vmatprep.subr.mxu0 %v946_v42  ;;  %v405_v30 = vadd.f32 %v380_v24, %v1226_v41  ;;  %v439_v0 = vmul.f32 %v423_v16, %v247_v27 }
 0x1ae   : > { %v807_v5 = vpop.eup %806  ;;  %v438_v22 = vmul.f32 %v422_v32, %v246_v40 }
 0x1af   : > { %v809_v6 = vpop.eup %808  ;;  %v378_v35 = vmul.f32 0.6931472, %v807_v5  ;;  %v421_v36 = vsub.f32 %v1164_v9, %v405_v30 }
 0x1b0   : > { %680 = vmatpush3.xpose.msra.mxu0 %v442_v58  ;;  %v376_v17 = vmul.f32 0.6931472, %v809_v6 }
 0x1b1   : > { %681 = vmatprep.subr.mxu0 %v946_v42  ;;  %v404_v33 = vadd.f32 %v378_v35, %v1232_v48  ;;  %v437_v39 = vmul.f32 %v421_v36, %v245_v37 }
 0x1b2   : > { %v811_v7 = vpop.eup %810  ;;  %v403_v38 = vadd.f32 %v376_v17, %v1234_v49 }
 0x1b3   : > { %v813_v41 = vpop.eup %812  ;;  %v374_v8 = vmul.f32 0.6931472, %v811_v7  ;;  %v420_v2 = vsub.f32 %v1169_v10, %v404_v33 }
 0x1b4   : > { %682 = vmatpush3.xpose.msra.mxu0 %v441_v63  ;;  %v372_v44 = vmul.f32 0.6931472, %v813_v41  ;;  %v419_v23 = vsub.f32 %v1172_v11, %v403_v38 }
 0x1b5   : > { %683 = vmatprep.subr.mxu0 %v946_v42  ;;  %v402_v9 = vadd.f32 %v374_v8, %v1240_v56  ;;  %v436_v45 = vmul.f32 %v420_v2, %v244_v43 }
 0x1b6   : > { %v815_v48 = vpop.eup %814  ;;  %v401_v10 = vadd.f32 %v372_v44, %v1242_v57  ;;  %v435_v47 = vmul.f32 %v419_v23, %v243_v1 }
 0x1b7   : > { %v817_v49 = vpop.eup %816  ;;  %v370_v46 = vmul.f32 0.6931472, %v815_v48  ;;  %v418_v50 = vsub.f32 %v1177_v12, %v402_v9 }
 0x1b8   : > { %684 = vmatpush3.xpose.msra.mxu0 %v440_v26  ;;  %v368_v56 = vmul.f32 0.6931472, %v817_v49  ;;  %v417_v52 = vsub.f32 %v1180_v13, %v401_v10  ;;  %v239_v13 = vld [vmem:[%s1122_s24] sm:$0xff] }
 0x1b9   : > { %685 = vmatprep.subr.mxu0 %v946_v42  ;;  %v400_v11 = vadd.f32 %v370_v46, %v1248_v18  ;;  %v434_v51 = vmul.f32 %v418_v50, %v242_v28 }
 0x1ba   : > { %v399_v57 = vadd.f32 %v368_v56, %v1250_v19  ;;  %v433_v53 = vmul.f32 %v417_v52, %v241_v3  ;;  %v948_v19 = vmov 1.0  }
 0x1bb   : > { %v416_v12 = vsub.f32 %v1185_v14, %v400_v11  ;;  %v519_v14 = vand.u32 127, %v518_v59 }
 0x1bc   : > { %686 = vmatpush3.xpose.msra.mxu0 %v439_v0  ;;  %v415_v55 = vsub.f32 %v1188_v15, %v399_v57 }
 0x1bd   : > { %687 = vmatprep.subr.mxu0 %v946_v42  ;;  %v432_v18 = vmul.f32 %v416_v12, %v240_v54  ;;  %v522_v4 = vadd.s32 %v521_v29, %v519_v14 }
 0x1be   : > { %v431_v58 = vmul.f32 %v415_v55, %v239_v13 }
 0x1bf   : > { %vm523_vm1 = vcmp.lt.s32.totalorder %v522_v4, 300 }
 0x1c0   : > { %688 = vmatpush3.xpose.msra.mxu0 %v438_v22 }
 0x1c1   : > { %689 = vmatprep.subr.mxu0 %v946_v42 }
 0x1c4   : > { %690 = vmatpush3.xpose.msra.mxu0 %v437_v39 }
 0x1c5   : > { %691 = vmatprep.subr.mxu0 %v946_v42 }
 0x1c8   : > { %692 = vmatpush3.xpose.msra.mxu0 %v436_v45 }
 0x1c9   : > { %693 = vmatprep.subr.mxu0 %v946_v42 }
 0x1cc   : > { %694 = vmatpush3.xpose.msra.mxu0 %v435_v47 }
 0x1cd   : > { %695 = vmatprep.subr.mxu0 %v946_v42 }
 0x1d0   : > { %696 = vmatpush3.xpose.msra.mxu0 %v434_v51 }
 0x1d1   : > { %697 = vmatprep.subr.mxu0 %v946_v42 }
 0x1d4   : > { %698 = vmatpush3.xpose.msra.mxu0 %v433_v53 }
 0x1d5   : > { %699 = vmatprep.subr.mxu0 %v946_v42 }
 0x1d8   : > { %700 = vmatpush3.xpose.msra.mxu0 %v432_v18 }
 0x1d9   : > { %701 = vmatprep.subr.mxu0 %v946_v42 }
 0x1dc   : > { %702 = vmatpush3.xpose.msra.mxu0 %v431_v58 }
 0x1df   : > { %704 = vmatmul.mubr.f32.vlgmr.msra.gmra.mxu0 %v948_v19 }
 0x29f   : > { %v513_v60 = vpop.f32.mrf.mxu0 }
 0x2a0   : > { %v517_v15 = vsub.f32 0.0, %v513_v60 }
 0x2a1   : > { %v705_v61 = vpop.f32.mrf.mxu0 }
 0x2a2   : > { %v524_v42 = vsel %vm523_vm1, %v517_v15, 0.0 }
 0x2a3   : > { %525 = vst [vmem:[%s212_s25] sm:$0x1] %v524_v42 }
 0x2a4   : > { %883 = shalt.err (!%p880_p3)
}
 0x2a5   : > { %s884_s27 = scalar_lea.hbm %s1327_s5, 16  ;;  %s888_s6 = scalar_lea.hbm %s1365_s2, 48 }
 0x2a6   : > { %p885_p9 = scmp.ne.s32.totalorder %s1327_s5, %s884_s27  ;;  %p889_p2 = scmp.lt.s32.totalorder %s1327_s5, %s1365_s2 }
 0x2a7   : > { %p890_p4 = scmp.lt.s32.totalorder %s888_s6, %s884_s27 }
 0x2a8   : > { %p886_p10 = pnand %p885_p9, %p1371_p5 }
 0x2a9   : > { %p891_p7 = por %p890_p4, %p889_p2 }
 0x2aa   : > { %p887_p13 = pneg %p886_p10 }
 0x2ac   : > { %p892_p6 = pnand %p891_p7, %p887_p13 }
 0x2ae   : > { %895 = shalt.err (!%p892_p6)
}
 0x2af   : > { %708 = dma.vmem_to_hbm [thread:$0]  (%p1371_p5), %s540_s30, 16, %s1327_s5, %s527_s8  }
 0x2b0 PF: > { %p714_p8 = scmp.ge.s32.totalorder %s938_s12, 2  ;;  %s551_s17 = sand.u32 1, %s926_s9  }
 0x2b1   : > { %p1372_p11 = scmp.ne.s32.totalorder %s1370_s22, 0  ;;  %s552_s24 = scalar_lea.sflag [#allocation4], %s551_s17 }
 0x2b3   : > { %p711_p12 = pnand %p714_p8, %p1372_p11 }
 0x2b5   : > { %p712_p0 = pneg %p711_p12 }
 0x2b7   : > { %921 = dma.done.wait (%p712_p0), %s552_s24, 16  }
 0x2b8   : > { %923 = vsyncadd (%p712_p0), %s552_s24, 4294967280  ;;  %p18_p1 = scmp.ge.s32.totalorder %s990_s15, 5   ;;  %s1373_s9 = smov %s930_s10 }
 0x2b9   : > { %s1374_s10 = smov %s934_s11  ;;  %s1375_s11 = smov %s1002_s18 }
 0x2ba   : > { %s1376_s12 = smov %s990_s15  ;;  %20 = sbr.rel (!%p18_p1) target bundleno = 7 (0x7), region = 86 }
 0x2bf   :  { %556 = vsyncpa [#allocation3], 1 }
 0x2c0   :  { %558 = vsyncpa [#allocation3 + $0x1], 1 }
 0x2c1   :  { %559 = vsyncpa [#allocation6], 1 }
 0x2c2   :  { %561 = vsyncpa [#allocation6 + $0x1], 1 }
 0x2c3   :  { %562 = vsyncpa [#allocation4], 1 }
 0x2c4   :  { %564 = vsyncpa [#allocation4 + $0x1], 1 }

</bundles_post_ra>
